<compile_context>
chip_gen: v7x
topology: tpu7x:2x2x1
jax: 0.10.0
libtpu: 0.0.40
codegen_flags: <defaults>
</compile_context>

<pallas_src>
import jax
import jax.numpy as jnp
from jax.experimental import pallas as pl
from jax.experimental.pallas import tpu as pltpu

HIDDEN = 64


def _round_up(x, m):
    return ((x + m - 1) // m) * m


def _make_kernel(state_dim, s_pad, hidden):
    """Kernel closure with static slab offsets baked in."""
    b_row = s_pad + 2 * hidden  # first bias row inside the slab

    def kernel(x_ref, w_ref, out_ref):
        x = x_ref[...]                                        # (B, S)

        # Static views into the packed parameter slab (zero-cost addressing).
        w1 = w_ref[0:state_dim, :]                            # (S, H)
        w2 = w_ref[s_pad:s_pad + hidden, :]                   # (H, H)
        wh = w_ref[s_pad + hidden:s_pad + 2 * hidden, :]      # (H, H); cols [0, A+1) live
        b1 = w_ref[b_row:b_row + 1, :]                        # (1, H)
        b2 = w_ref[b_row + 1:b_row + 2, :]                    # (1, H)
        bh = w_ref[b_row + 2:b_row + 3, :]                    # (1, H); cols [0, A+1) live

        # shared[0]: Linear(S, 64) + ReLU
        h1 = jnp.maximum(
            jnp.dot(x, w1, preferred_element_type=jnp.float32) + b1, 0.0)
        # shared[2]: Linear(64, 64) + ReLU
        h2 = jnp.maximum(
            jnp.dot(h1, w2, preferred_element_type=jnp.float32) + b2, 0.0)
        # fused heads: [actor_mean | critic | zero-pad] in one matmul + one store
        out_ref[...] = (
            jnp.dot(h2, wh, preferred_element_type=jnp.float32) + bh
        ).astype(out_ref.dtype)

    return kernel


def actor_critic_forward(state, params):
    """state: (B, state_dim) f32. Returns (mean (B, A), log_std (A,), value (B, 1))."""
    B, S = state.shape
    A = params["log_std"].shape[0]
    hidden = HIDDEN
    s_pad = _round_up(S, 8)

    # Advisory cost hint: three small matmuls, a few 10s of KiB of traffic.
    flops = 2 * B * (S * hidden + hidden * hidden + hidden * hidden)
    bytes_accessed = 4 * (state.size + params["w_slab"].size + B * hidden)

    vmem = pl.BlockSpec(memory_space=pltpu.MemorySpace.VMEM)
    packed_out = pl.pallas_call(
        _make_kernel(S, s_pad, hidden),
        out_shape=jax.ShapeDtypeStruct((B, hidden), jnp.float32),
        in_specs=[vmem, vmem],
        out_specs=vmem,
        cost_estimate=pl.CostEstimate(
            flops=flops, transcendentals=0, bytes_accessed=bytes_accessed),
    )(state, params["w_slab"])

    mean = packed_out[:, :A]
    value = packed_out[:, A:A + 1]
    # actor_log_std is a raw nn.Parameter returned untouched by forward().
    return mean, params["log_std"], value


def init_params(key, state_dim, action_dim, hidden=HIDDEN):
    """Deterministic init. Raw params kept for the reference; packed slab for the kernel."""
    ks = jax.random.split(key, 8)

    def uni(k, shape, fan_in):
        bound = 1.0 / jnp.sqrt(jnp.float32(fan_in))
        return jax.random.uniform(k, shape, jnp.float32, -bound, bound)

    raw = {
        "w1": uni(ks[0], (state_dim, hidden), state_dim),
        "b1": uni(ks[1], (1, hidden), state_dim),
        "w2": uni(ks[2], (hidden, hidden), hidden),
        "b2": uni(ks[3], (1, hidden), hidden),
        "wm": uni(ks[4], (hidden, action_dim), hidden),
        "bm": uni(ks[5], (1, action_dim), hidden),
        "wc": uni(ks[6], (hidden, 1), hidden),
        "bc": uni(ks[7], (1, 1), hidden),
        # nn.Parameter(torch.zeros(action_dim))
        "log_std": jnp.zeros((action_dim,), jnp.float32),
    }

    # --- pack everything into a single contiguous f32 slab (rows x hidden) ---
    s_pad = _round_up(state_dim, 8)
    n_rows = s_pad + 2 * hidden + 3
    w_heads = jnp.concatenate([raw["wm"], raw["wc"]], axis=1)   # (H, A+1)
    b_heads = jnp.concatenate([raw["bm"], raw["bc"]], axis=1)   # (1, A+1)

    slab = jnp.zeros((n_rows, hidden), jnp.float32)
    slab = slab.at[0:state_dim, :].set(raw["w1"])
    slab = slab.at[s_pad:s_pad + hidden, :].set(raw["w2"])
    slab = slab.at[s_pad + hidden:s_pad + 2 * hidden, 0:action_dim + 1].set(w_heads)
    b_row = s_pad + 2 * hidden
    slab = slab.at[b_row, :].set(raw["b1"][0])
    slab = slab.at[b_row + 1, :].set(raw["b2"][0])
    slab = slab.at[b_row + 2, 0:action_dim + 1].set(b_heads[0])

    raw["w_slab"] = slab
    return raw


def reference_forward(state, params):
    h1 = jnp.maximum(state @ params["w1"] + params["b1"], 0.0)
    h2 = jnp.maximum(h1 @ params["w2"] + params["b2"], 0.0)
    mean = h2 @ params["wm"] + params["bm"]
    value = h2 @ params["wc"] + params["bc"]
    return mean, params["log_std"], value


if __name__ == "__main__":
    # rocketlander-v0: continuous action space (3,), observation space (10,)
    STATE_DIM, ACTION_DIM, BATCH = 10, 3, 8

    key = jax.random.PRNGKey(0)
    k_params, k_state = jax.random.split(key)
    params = init_params(k_params, STATE_DIM, ACTION_DIM)
    state = jax.random.normal(k_state, (BATCH, STATE_DIM), jnp.float32)

    mean, log_std, value = actor_critic_forward(state, params)
    jax.block_until_ready((mean, log_std, value))

    # sanity check vs plain-JAX reference
    ref_mean, ref_log_std, ref_value = reference_forward(state, params)
    assert mean.shape == (BATCH, ACTION_DIM)
    assert log_std.shape == (ACTION_DIM,)
    assert value.shape == (BATCH, 1)
    assert jnp.allclose(mean, ref_mean, atol=1e-5)
    assert jnp.allclose(value, ref_value, atol=1e-5)
    assert jnp.allclose(log_std, ref_log_std)

    print("KERNEL_OK")
</pallas_src>

<mosaic_0001>
module attributes {stable_mosaic.version = 11 : i64} {
  func.func @kernel(%arg0: memref<8x10xf32, #tpu.memory_space<vmem>>, %arg1: memref<147x64xf32, #tpu.memory_space<vmem>>, %arg2: memref<8x64xf32, #tpu.memory_space<vmem>>) attributes {dimension_semantics = [], scalar_prefetch = 0 : i64, scratch_operands = 0 : i64, tpu.core_type = #tpu.core_type<tc>} {
    %c0 = arith.constant 0 : index
    %c0_0 = arith.constant 0 : index
    %0 = vector.load %arg0[%c0, %c0_0] : memref<8x10xf32, #tpu.memory_space<vmem>>, vector<8x10xf32>
    %c0_1 = arith.constant 0 : index
    %c0_2 = arith.constant 0 : index
    %1 = vector.load %arg1[%c0_1, %c0_2] : memref<147x64xf32, #tpu.memory_space<vmem>>, vector<10x64xf32>
    %c16 = arith.constant 16 : index
    %c0_3 = arith.constant 0 : index
    %2 = vector.load %arg1[%c16, %c0_3] : memref<147x64xf32, #tpu.memory_space<vmem>>, vector<64x64xf32>
    %c80 = arith.constant 80 : index
    %c0_4 = arith.constant 0 : index
    %3 = vector.load %arg1[%c80, %c0_4] : memref<147x64xf32, #tpu.memory_space<vmem>>, vector<64x64xf32>
    %c144 = arith.constant 144 : index
    %c0_5 = arith.constant 0 : index
    %4 = vector.load %arg1[%c144, %c0_5] : memref<147x64xf32, #tpu.memory_space<vmem>>, vector<1x64xf32>
    %c145 = arith.constant 145 : index
    %c0_6 = arith.constant 0 : index
    %5 = vector.load %arg1[%c145, %c0_6] : memref<147x64xf32, #tpu.memory_space<vmem>>, vector<1x64xf32>
    %c146 = arith.constant 146 : index
    %c0_7 = arith.constant 0 : index
    %6 = vector.load %arg1[%c146, %c0_7] : memref<147x64xf32, #tpu.memory_space<vmem>>, vector<1x64xf32>
    %cst = arith.constant dense<0.000000e+00> : vector<8x64xf32>
    %7 = tpu.matmul %0, %1, %cst {dimension_numbers = #tpu.dot_dimension_numbers<[1], [0], [0], [1], [0, 0, 1, 1], [], []>} : vector<8x10xf32>, vector<10x64xf32>, vector<8x64xf32> -> vector<8x64xf32>
    %8 = vector.broadcast %4 : vector<1x64xf32> to vector<8x64xf32>
    %9 = arith.addf %7, %8 : vector<8x64xf32>
    %cst_8 = arith.constant 0.000000e+00 : f32
    %10 = vector.broadcast %cst_8 : f32 to vector<8x64xf32>
    %11 = arith.maximumf %9, %10 : vector<8x64xf32>
    %cst_9 = arith.constant dense<0.000000e+00> : vector<8x64xf32>
    %12 = tpu.matmul %11, %2, %cst_9 {dimension_numbers = #tpu.dot_dimension_numbers<[1], [0], [0], [1], [0, 0, 1, 1], [], []>} : vector<8x64xf32>, vector<64x64xf32>, vector<8x64xf32> -> vector<8x64xf32>
    %13 = vector.broadcast %5 : vector<1x64xf32> to vector<8x64xf32>
    %14 = arith.addf %12, %13 : vector<8x64xf32>
    %cst_10 = arith.constant 0.000000e+00 : f32
    %15 = vector.broadcast %cst_10 : f32 to vector<8x64xf32>
    %16 = arith.maximumf %14, %15 : vector<8x64xf32>
    %cst_11 = arith.constant dense<0.000000e+00> : vector<8x64xf32>
    %17 = tpu.matmul %16, %3, %cst_11 {dimension_numbers = #tpu.dot_dimension_numbers<[1], [0], [0], [1], [0, 0, 1, 1], [], []>} : vector<8x64xf32>, vector<64x64xf32>, vector<8x64xf32> -> vector<8x64xf32>
    %18 = vector.broadcast %6 : vector<1x64xf32> to vector<8x64xf32>
    %19 = arith.addf %17, %18 : vector<8x64xf32>
    %c0_12 = arith.constant 0 : index
    %c0_13 = arith.constant 0 : index
    %20 = vector.load %arg2[%c0_12, %c0_13] : memref<8x64xf32, #tpu.memory_space<vmem>>, vector<8x64xf32>
    tpu.vector_store %arg2[%c0_12, %c0_13], %19 {strides = array<i32>} : memref<8x64xf32, #tpu.memory_space<vmem>>, vector<8x64xf32>,
    return
  }
}

</mosaic_0001>

<bundles_post_ra>
// kernel: tpu_custom_call.1
= control target key start
LH: loop header
LB: loop body
LE: loop exit
PB: predicated region body
PF: predicated region fallthrough
CT: control target
= control target key end

     0   :  { %vm42_vm0 = vcmask 1041408   ;;  %v418_v2 = vmov 0.0|0.0   ;;  %vm419_vm1 = vmmov 1   ;;  %vm420_vm3 = vmmov 0   ;;  %s522_s0 = inlined_call_operand.vmem [shape: f32[8,10], index: 0, kind: input, shape index: {}]   ;;  %s523_s1 = inlined_call_operand.vmem [shape: f32[147,64], index: 1, kind: input, shape index: {}]   ;;  %s524_s2 = inlined_call_operand.hbm [shape: f32[8,64], index: 2, kind: output, shape index: {}]  }
   0x1   :  { %v13_v0 = vld [vmem:[%s523_s1] sm:$0xff]  ;;  %v14_v1 = vld [vmem:[%s523_s1 + $0x8] sm:$0x3]  ;;  %361 = vmatprep.subr.bf16.mxu0 %v418_v2  ;;  %vm363_vm2 = vmpackc.low %vm42_vm0, %vm419_vm1  ;;  %365 = vmatprep.subr.bf16.mxu1 %v418_v2  ;;  %v421_v5 = vmov 0.0   ;;  %vm38_vm4 = vcmask 80896  }
   0x2   :  { %v362_v3 = vpack.c.bf16 %v14_v1, %v13_v0  ;;  %v15_v4 = vld [vmem:[%s523_s1 + $0x10] sm:$0xff]  ;;  %320 = vmatprep.mubr.msk.f32.mxu0 %vm420_vm3, %v421_v5  ;;  %v16_v6 = vld [vmem:[%s523_s1 + $0x18] sm:$0xff]  ;;  %v17_v7 = vld [vmem:[%s523_s1 + $0x20] sm:$0xff]  ;;  %339 = vmatprep.mubr.msk.f32.mxu1 %vm420_vm3, %v421_v5 }
   0x3   :  { %v18_v8 = vld [vmem:[%s523_s1 + $0x28] sm:$0xff]  ;;  %v12_v9 = vld [vmem:[%s522_s0] sm:$0xff]  ;;  %v366_v10 = vpack.c.bf16 %v16_v6, %v15_v4 }
   0x4   :  { %364 = vmatpush3.bf16.msk.msra.mxu0 %vm363_vm2, %v362_v3 }
   0x5   :  { %377 = vmatprep.subr.bf16.mxu0 %v418_v2 }
   0x6   :  { %7 = vsyncpa [#allocation3], 0  ;;  %367 = vmatpush3.bf16.msra.mxu1 %v366_v10  ;;  %v369_v11 = vpack.c.bf16 %v18_v8, %v17_v7  ;;  %v19_v12 = vld [vmem:[%s523_s1 + $0x30] sm:$0xff]  ;;  %v20_v13 = vld [vmem:[%s523_s1 + $0x38] sm:$0xff]  ;;  %vm121_vm5 = vcmask 523264   ;;  %s422_s24 = smov [#allocation2]  }
   0x7   :  { %321 = vmatmul.mubr.msk.f32.vlgmr.msra.gmra.mrb[0].mxu0 %vm38_vm4, %v12_v9  ;;  %368 = vmatprep.subr.bf16.mxu1 %v418_v2  ;;  %v372_v14 = vpack.c.bf16 %v20_v13, %v19_v12  ;;  %v21_v15 = vld [vmem:[%s523_s1 + $0x40] sm:$0xff]  ;;  %v22_v16 = vld [vmem:[%s523_s1 + $0x48] sm:$0xff]  ;;  %v23_v18 = vld [vmem:[%s523_s1 + $0x50] sm:$0xff]  ;;  %s280_s25 = sshll.u32 %s422_s24, 4  ;;  %s281_s25 = int_to_ptr.vmem [resolvable:$true] %s280_s25 }
   0x8   :  { %358 = vmatprep.mubr.msk.f32.mxu0 %vm420_vm3, %v421_v5  ;;  %v375_v17 = vpack.c.bf16 %v22_v16, %v21_v15  ;;  %v24_v19 = vld [vmem:[%s523_s1 + $0x58] sm:$0xff]  ;;  %v25_v20 = vld [vmem:[%s523_s1 + $0x60] sm:$0xff]  ;;  %v26_v22 = vld [vmem:[%s523_s1 + $0x68] sm:$0xff]  ;;  %s394_s26 = scalar_lea.vmem %s281_s25, 128  ;;  %p399_p1 = scmp.lt.s32.totalorder %s281_s25, %s281_s25 }
   0x9   :  { %v378_v21 = vpack.c.bf16 %v24_v19, %v23_v18  ;;  %v381_v23 = vpack.c.bf16 %v26_v22, %v25_v20  ;;  %v27_v24 = vld [vmem:[%s523_s1 + $0x70] sm:$0xff]  ;;  %v28_v25 = vld [vmem:[%s523_s1 + $0x78] sm:$0xff]  ;;  %v29_v32 = vld [vmem:[%s523_s1 + $0x80] sm:$0xff]  ;;  %p395_p0 = scmp.ne.s32.totalorder %s281_s25, %s394_s26  ;;  %p400_p2 = scmp.lt.s32.totalorder %s394_s26, %s394_s26 }
   0xa   :  { %370 = vmatpush3.bf16.msra.mxu1 %v369_v11  ;;  %v384_v26 = vpack.c.bf16 %v28_v25, %v27_v24  ;;  %v288_v27 = vld [vmem:[%s523_s1 + $0x90] ss:$0 sm:$0xff]  ;;  %v30_v33 = vld [vmem:[%s523_s1 + $0x88] sm:$0xff]  ;;  %v291_v35 = vld [vmem:[%s523_s1 + $0x91] ss:$0 sm:$0xff] }
   0xb   :  { %371 = vmatprep.subr.bf16.mxu1 %v418_v2  ;;  %379 = vmatpush3.bf16.msra.mxu0 %v378_v21  ;;  %v387_v34 = vpack.c.bf16 %v30_v33, %v29_v32  ;;  %v293_v40 = vld [vmem:[%s523_s1 + $0x92] ss:$0 sm:$0xff]  ;;  %p401_p3 = por %p400_p2, %p399_p1 }
   0xc   :  { %380 = vmatprep.subr.bf16.mxu0 %v418_v2 }
   0xd   :  { %p402_p4 = pnand %p401_p3, %p395_p0 }
   0xe   :  { %373 = vmatpush3.bf16.msra.mxu1 %v372_v14 }
   0xf   :  { %374 = vmatprep.subr.bf16.mxu1 %v418_v2  ;;  %382 = vmatpush3.bf16.msra.mxu0 %v381_v23 }
  0x10   :  { %383 = vmatprep.subr.bf16.mxu0 %v418_v2 }
  0x12   :  { %376 = vmatpush3.bf16.msra.mxu1 %v375_v17 }
  0x13   :  { %385 = vmatpush3.bf16.msra.mxu0 %v384_v26 }
  0x14   :  { %386 = vmatprep.subr.bf16.mxu0 %v418_v2 }
  0x17   :  { %388 = vmatpush3.bf16.msra.mxu0 %v387_v34 }
  0xda   :  { %v112_v28 = vpop.f32.mrb[0].mxu0 }
  0xdb   :  { %v113_v29 = vadd.f32 %v288_v27, %v112_v28  ;;  %v322_v30 = vpop.f32.mrb[1].mxu0 }
  0xdd   :  { %v116_v31 = vmax.f32 %v113_v29, 0.0 }
  0xdf   :  { %340 = vmatmul.mubr.msk.f32.vlgmr.msra.gmra.mrb[0].mxu1 %vm121_vm5, %v116_v31 }
 0x1b2   :  { %v191_v36 = vpop.f32.mrb[0].mxu1 }
 0x1b3   :  { %v192_v37 = vadd.f32 %v291_v35, %v191_v36  ;;  %v341_v38 = vpop.f32.mrb[1].mxu1 }
 0x1b5   :  { %v195_v39 = vmax.f32 %v192_v37, 0.0 }
 0x1b7   :  { %359 = vmatmul.mubr.msk.f32.vlgmr.msra.gmra.mrb[2].mxu0 %vm121_vm5, %v195_v39 }
 0x28a   :  { %v269_v41 = vpop.f32.mrb[2].mxu0 }
 0x28b   :  { %v270_v42 = vadd.f32 %v293_v40, %v269_v41  ;;  %v360_v43 = vpop.f32.mrb[3].mxu0 }
 0x28d   :  { %273 = vst.msk [vmem:[#allocation2] sm:$0xff] %vm121_vm5, %v270_v42 }
 0x28e   :  { %405 = shalt.err (!%p402_p4)
}
 0x28f   :  { %s406_s28 = scalar_lea.hbm %s524_s2, 128 }
 0x290   :  { %p407_p5 = scmp.ne.s32.totalorder %s524_s2, %s406_s28  ;;  %p410_p6 = scmp.lt.u32.totalorder %s406_s28, %s524_s2 }
 0x292   :  { %p412_p7 = pnand %p410_p6, %p407_p5 }
 0x294   :  { %415 = shalt.err (!%p412_p7)
}
 0x295   :  { %283 = dma.vmem_to_hbm [thread:$0]  %s281_s25, 128, %s524_s2, [#allocation3]  }
 0x296   :  { %416 = dma.done.wait [#allocation3], 128  }
 0x297   :  { %417 = vsyncadd [#allocation3], 4294967168 }
 0x298   :  { %287 = vsyncpa [#allocation3], 1 }

</bundles_post_ra>
